<compile_context>
chip_gen: v7x
topology: tpu7x:2x2x1
jax: 0.10.0
libtpu: 0.0.40
codegen_flags: <defaults>
</compile_context>

<pallas_src>
import functools

import jax
import jax.numpy as jnp
import numpy as np
from jax.experimental import pallas as pl
from jax.experimental.pallas import tpu as pltpu


def _round_up(v: int, n: int) -> int:
    return (v + n - 1) // n * n


def _mlp_kernel(x_ref, w1_ref, w2_ref, o_ref, *, h_chunk: int):
    """Fused MLP for one token tile.

    x_ref : (TM, D)  activations (bf16)
    w1_ref: (D, H)   c_fc.weight.T   (bf16, VMEM-resident, single-buffered)
    w2_ref: (H, D)   c_proj.weight.T (bf16, VMEM-resident, single-buffered)
    o_ref : (TM, D)  output (original x dtype)
    """
    x = x_ref[...].astype(jnp.bfloat16)
    tm, d = o_ref.shape
    hdim = w1_ref.shape[1]

    acc = jnp.zeros((tm, d), jnp.float32)
    # Static (compile-time) loop over H chunks: bounds the f32 intermediate to
    # (tm, h_chunk) and lets chunk j's relu^2 hide under chunk j+1's matmul.
    for c0 in range(0, hdim, h_chunk):
        # dot1 chunk on the MXU (bf16 operands, f32 accumulation).
        h = jnp.dot(x, w1_ref[:, c0:c0 + h_chunk],
                    preferred_element_type=jnp.float32)
        # relu(.)^2 on the VPU in f32 (v5e-safe).
        h = jnp.maximum(h, 0.0)
        h = h * h
        # dot2 partial, accumulated in f32; downcast only at the dot input.
        acc = acc + jnp.dot(h.astype(jnp.bfloat16), w2_ref[c0:c0 + h_chunk, :],
                            preferred_element_type=jnp.float32)
    o_ref[...] = acc.astype(o_ref.dtype)


def prepare_mlp_weights(w_fc, w_proj):
    """One-time (model-setup) weight prep: torch layout (H,D)/(D,H) -> (D,H)/(H,D) bf16.

    Call once and reuse; keeps the transpose/cast out of the per-forward hot path.
    """
    return w_fc.T.astype(jnp.bfloat16), w_proj.T.astype(jnp.bfloat16)


def mlp_forward(x, w1t, w2t, *, block_tokens: int = 256):
    """Pallas MLP forward.

    x   : (..., D)    activations
    w1t : (D, H)      prepared c_fc.weight.T   (bf16)
    w2t : (H, D)      prepared c_proj.weight.T (bf16)
    returns: same shape / dtype as x
    """
    orig_shape = x.shape
    dim = orig_shape[-1]
    hdim = w1t.shape[1]
    assert w1t.shape == (dim, hdim) and w2t.shape == (hdim, dim)

    xt = x.reshape(-1, dim)
    t = xt.shape[0]

    # Stream activations as bf16 (halves the per-tile DMA); output keeps x.dtype.
    if xt.dtype == jnp.float32:
        xt = xt.astype(jnp.bfloat16)

    # Token tiling: 16-row aligned (bf16 packing), default 256-row tiles (fills the
    # 256x256 MXU on v6e/v7x; v5e's 128x128 MXU just runs 2 passes per tile). If the
    # whole problem fits a single >=256-row tile, split into two so v7x's two
    # TensorCores both get a "parallel" grid step.
    t16 = _round_up(t, 16)
    n_tiles = max(1, pl.cdiv(t16, block_tokens))
    if n_tiles == 1 and t16 >= 256:
        n_tiles = 2
    tm = _round_up(pl.cdiv(t16, n_tiles), 16)
    t_pad = tm * n_tiles
    if t_pad != t:
        xt = jnp.pad(xt, ((0, t_pad - t), (0, 0)))

    # Hidden-dim chunk processed per inner step (bounds the f32 intermediate).
    h_chunk = 512 if (hdim > 512 and hdim % 512 == 0) else hdim

    x_bytes = xt.dtype.itemsize
    o_bytes = jnp.dtype(x.dtype).itemsize
    # VMEM budget: single-buffered bf16 weights + double-buffered x/out tiles
    # + one H-chunk of f32/bf16 intermediates + f32 accumulator + headroom.
    vmem_needed = (
        2 * dim * hdim * 2                 # both weights, bf16, single-buffered
        + 2 * tm * dim * x_bytes           # x tile, double-buffered
        + 2 * tm * dim * o_bytes           # out tile, double-buffered
        + tm * h_chunk * (4 + 2)           # f32 hidden chunk + bf16 copy
        + tm * dim * 4                     # f32 accumulator
        + (4 << 20)                        # headroom
    )
    vmem_limit = int(min(max(vmem_needed, 16 << 20), 48 << 20))

    cost = pl.CostEstimate(
        flops=4 * t_pad * dim * hdim,      # two matmuls, 2 flops/MAC each
        transcendentals=0,
        bytes_accessed=t_pad * dim * (x_bytes + o_bytes) + 2 * dim * hdim * 2,
    )

    out = pl.pallas_call(
        functools.partial(_mlp_kernel, h_chunk=h_chunk),
        out_shape=jax.ShapeDtypeStruct((t_pad, dim), x.dtype),
        grid=(n_tiles,),
        in_specs=[
            pl.BlockSpec((tm, dim), lambda i: (i, 0)),
            # Constant block index -> fetched once and resident across grid steps;
            # Buffered(1) avoids allocating a useless second buffer per weight.
            pl.BlockSpec((dim, hdim), lambda i: (0, 0), pipeline_mode=pl.Buffered(1)),
            pl.BlockSpec((hdim, dim), lambda i: (0, 0), pipeline_mode=pl.Buffered(1)),
        ],
        out_specs=pl.BlockSpec((tm, dim), lambda i: (i, 0)),
        compiler_params=pltpu.CompilerParams(
            dimension_semantics=("parallel",),
            vmem_limit_bytes=vmem_limit,
        ),
        cost_estimate=cost,
    )(xt, w1t, w2t)

    if t_pad != t:
        out = out[:t]
    return out.reshape(orig_shape)


# ----------------------------- init & reference -------------------------------


def _casted_linear_init(key, out_features, in_features):
    """CastedLinear.reset_parameters: U(-bound, bound), bound = sqrt(3) * 0.5 / sqrt(in)."""
    std = 0.5 * in_features ** -0.5
    bound = 3 ** 0.5 * std
    return jax.random.uniform(key, (out_features, in_features), jnp.float32,
                              -bound, bound)


def mlp_reference(x, w_fc, w_proj):
    """Pure-JAX reference with the same bf16-at-the-dot numerics (torch-layout weights)."""
    xb = x.astype(jnp.bfloat16).astype(jnp.float32)
    h = xb @ w_fc.T.astype(jnp.bfloat16).astype(jnp.float32)
    h = jnp.maximum(h, 0.0) ** 2
    hb = h.astype(jnp.bfloat16).astype(jnp.float32)
    return hb @ w_proj.T.astype(jnp.bfloat16).astype(jnp.float32)


if __name__ == "__main__":
    key = jax.random.PRNGKey(0)
    k_x, k_fc, k_proj = jax.random.split(key, 3)

    # Small shapes consistent with the module: batch=2, seq=128, dim=128 (hdim = 4*dim = 512).
    batch, seq, dim = 2, 128, 128
    hdim = 4 * dim

    x = jax.random.normal(k_x, (batch, seq, dim), jnp.float32).astype(jnp.bfloat16)
    w_fc = _casted_linear_init(k_fc, hdim, dim)
    # NOTE: train_gpt.py zero-initializes c_proj.weight; a uniform init is used here so
    # the kernel computes something non-trivial (shapes / semantics are identical).
    w_proj = _casted_linear_init(k_proj, dim, hdim)

    # One-time weight prep, kept out of the per-forward hot path.
    w1t, w2t = prepare_mlp_weights(w_fc, w_proj)
    w1t = jax.block_until_ready(w1t)
    w2t = jax.block_until_ready(w2t)

    run = jax.jit(mlp_forward)
    out = jax.block_until_ready(run(x, w1t, w2t))

    ref = mlp_reference(x.astype(jnp.float32), w_fc, w_proj)
    np.testing.assert_allclose(np.asarray(out, dtype=np.float32),
                               np.asarray(ref, dtype=np.float32),
                               rtol=2e-2, atol=2e-2)
    assert out.shape == x.shape and out.dtype == x.dtype
    print("KERNEL_OK")
</pallas_src>

<mosaic_0001>
module attributes {stable_mosaic.version = 11 : i64} {
  func.func @_mlp_kernel(%arg0: i32, %arg1: memref<128x128xbf16, #tpu.memory_space<vmem>>, %arg2: memref<128x512xbf16, #tpu.memory_space<vmem>>, %arg3: memref<512x128xbf16, #tpu.memory_space<vmem>>, %arg4: memref<128x128xbf16, #tpu.memory_space<vmem>>) attributes {dimension_semantics = [#tpu.dimension_semantics<parallel>], iteration_bounds = array<i64: 2>, scalar_prefetch = 0 : i64, scratch_operands = 0 : i64, tpu.core_type = #tpu.core_type<tc>, window_params = [{transform_indices = @transform_0, window_bounds = array<i64: 128, 128>}, {pipeline_mode = #tpu.pipeline_mode<synchronous>, transform_indices = @transform_1, window_bounds = array<i64: 128, 512>}, {pipeline_mode = #tpu.pipeline_mode<synchronous>, transform_indices = @transform_2, window_bounds = array<i64: 512, 128>}, {transform_indices = @transform_3, window_bounds = array<i64: 128, 128>}]} {
    %c0 = arith.constant 0 : index
    %c0_0 = arith.constant 0 : index
    %0 = vector.load %arg1[%c0, %c0_0] : memref<128x128xbf16, #tpu.memory_space<vmem>>, vector<128x128xbf16>
    %cst = arith.constant 0.000000e+00 : f32
    %1 = vector.broadcast %cst : f32 to vector<128x128xf32>
    %c0_1 = arith.constant 0 : index
    %c0_2 = arith.constant 0 : index
    %2 = vector.load %arg2[%c0_1, %c0_2] : memref<128x512xbf16, #tpu.memory_space<vmem>>, vector<128x512xbf16>
    %cst_3 = arith.constant dense<0.000000e+00> : vector<128x512xf32>
    %3 = tpu.matmul %0, %2, %cst_3 {dimension_numbers = #tpu.dot_dimension_numbers<[1], [0], [0], [1], [0, 0, 1, 1], [], []>} : vector<128x128xbf16>, vector<128x512xbf16>, vector<128x512xf32> -> vector<128x512xf32>
    %cst_4 = arith.constant 0.000000e+00 : f32
    %4 = vector.broadcast %cst_4 : f32 to vector<128x512xf32>
    %5 = arith.maximumf %3, %4 : vector<128x512xf32>
    %6 = arith.mulf %5, %5 : vector<128x512xf32>
    %7 = arith.truncf %6 : vector<128x512xf32> to vector<128x512xbf16>
    %c0_5 = arith.constant 0 : index
    %c0_6 = arith.constant 0 : index
    %8 = vector.load %arg3[%c0_5, %c0_6] : memref<512x128xbf16, #tpu.memory_space<vmem>>, vector<512x128xbf16>
    %cst_7 = arith.constant dense<0.000000e+00> : vector<128x128xf32>
    %9 = tpu.matmul %7, %8, %cst_7 {dimension_numbers = #tpu.dot_dimension_numbers<[1], [0], [0], [1], [0, 0, 1, 1], [], []>} : vector<128x512xbf16>, vector<512x128xbf16>, vector<128x128xf32> -> vector<128x128xf32>
    %10 = arith.addf %1, %9 : vector<128x128xf32>
    %11 = arith.truncf %10 : vector<128x128xf32> to vector<128x128xbf16>
    %c0_8 = arith.constant 0 : index
    %c0_9 = arith.constant 0 : index
    %12 = vector.load %arg4[%c0_8, %c0_9] : memref<128x128xbf16, #tpu.memory_space<vmem>>, vector<128x128xbf16>
    tpu.vector_store %arg4[%c0_8, %c0_9], %11 {strides = array<i32>} : memref<128x128xbf16, #tpu.memory_space<vmem>>, vector<128x128xbf16>,
    return
  }
  func.func @transform_0(%arg0: i32) -> (i32, i32) {
    %c0_i32 = arith.constant 0 : i32
    %c0_i32_0 = arith.constant 0 : i32
    return %arg0, %c0_i32 : i32, i32
  }
  func.func @transform_1(%arg0: i32) -> (i32, i32) {
    %c0_i32 = arith.constant 0 : i32
    %c0_i32_0 = arith.constant 0 : i32
    %c0_i32_1 = arith.constant 0 : i32
    return %c0_i32, %c0_i32_0 : i32, i32
  }
  func.func @transform_2(%arg0: i32) -> (i32, i32) {
    %c0_i32 = arith.constant 0 : i32
    %c0_i32_0 = arith.constant 0 : i32
    %c0_i32_1 = arith.constant 0 : i32
    return %c0_i32, %c0_i32_0 : i32, i32
  }
  func.func @transform_3(%arg0: i32) -> (i32, i32) {
    %c0_i32 = arith.constant 0 : i32
    %c0_i32_0 = arith.constant 0 : i32
    return %arg0, %c0_i32 : i32, i32
  }
}

</mosaic_0001>

<bundles_post_ra>
// kernel: mlp_forward.1
= control target key start
LH: loop header
LB: loop body
LE: loop exit
PB: predicated region body
PF: predicated region fallthrough
CT: control target
= control target key end

     0   :  { %8 = vsyncpa [#allocation3], 0  ;;  %s2430_s0 = inlined_call_operand.hbm [shape: bf16[256,128], index: 0, kind: input, shape index: {}]   ;;  %s2431_s1 = inlined_call_operand.hbm [shape: bf16[128,512], index: 1, kind: input, shape index: {}]   ;;  %s2432_s2 = inlined_call_operand.hbm [shape: bf16[512,128], index: 2, kind: input, shape index: {}]   ;;  %s2433_s3 = inlined_call_operand.hbm [shape: bf16[256,128], index: 3, kind: output, shape index: {}]  }
   0x1   :  { %10 = vsyncpa [#allocation3 + $0x1], 0 }
   0x2   :  { %11 = vsyncpa [#allocation6], 0 }
   0x3   :  { %12 = vsyncpa [#allocation4], 0 }
   0x4   :  { %14 = vsyncpa [#allocation4 + $0x1], 0  ;;  %s2149_s12 = smov 0   ;;  %s2151_s13 = smov 0  }
   0x5   :  { %s2153_s14 = smov 0   ;;  %s2155_s15 = smov 0  }
   0x6 LB: > { %s2170_s16 = sadd.s32 4294967295, %s2116_s15   ;;  %s1499_s17 = sadd.s32 4294967294, %s2116_s15   ;;  %s2116_s15 = sphi %s2155_s15, %s2453_s15   ;;  %s2112_s14 = sphi %s2153_s14, %s2452_s14   ;;  %s2108_s13 = sphi %s2151_s13, %s2451_s13   ;;  %s2104_s12 = sphi %s2149_s12, %s2450_s12  }
   0x7   : > { %p40_p0 = scmp.ne.s32.totalorder %s2108_s13, %s2104_s12  ;;  %p2434_p1 = scmp.eq.s32.totalorder %s2170_s16, 0 }
   0x8   : > { %p112_p3 = scmp.eq.s32.totalorder %s1499_s17, 1  ;;  %p1500_p5 = scmp.ge.s32.totalorder %s2116_s15, 1 }
   0x9   : > { %p2179_p4 = por %p2434_p1, %p40_p0  ;;  %p119_p7 = scmp.lt.s32.totalorder %s2116_s15, 3 }
   0xa   : > { %p2184_p6 = por %p112_p3, %p40_p0  ;;  %s2118_s21 = smov [#allocation5]  }
   0xb   : > { %s2437_s18 = scalar_select %p2179_p4, 1, 0 }
   0xc   : > { %s2438_s19 = scalar_select %p2184_p6, 1, 0 }
   0xd   : > { %p2189_p8 = pnand %p1500_p5, %p119_p7  ;;  %s131_s22 = sshll.u32 %s2118_s21, 4  ;;  %s2193_s22 = int_to_ptr.vmem [resolvable:$true] %s131_s22 }
   0xe   : > { %s2119_s24 = smov [#allocation7]   ;;  %s1960_s28 = scalar_lea.hbm %s2431_s1, 4096 }
   0xf   : > { %p1810_p9 = pneg %p2189_p8  ;;  %s144_s25 = sshll.u32 %s2119_s24, 4  ;;  %s2204_s25 = int_to_ptr.vmem [resolvable:$true] %s144_s25 }
  0x10   : > { %p1961_p12 = scmp.ne.s32.totalorder %s2431_s1, %s1960_s28  ;;  %p1967_p5 = scmp.lt.u32.totalorder %s1960_s28, %s2431_s1 }
  0x11   : > { %p2200_p11 = pnand %p1810_p9, %p2434_p1 }
  0x13   : > { %p1962_p13 = pneg %p2200_p11 }
  0x15   : > { %p1963_p0 = pnand %p1962_p13, %p1961_p12 }
  0x17   : > { %p1964_p3 = pneg %p1963_p0 }
  0x19   : > { %p1969_p7 = pnand %p1967_p5, %p1964_p3 }
  0x1b   : > { %1972 = shalt.err (!%p1969_p7)
}
  0x1c   : > { %s1973_s6 = scalar_lea.vmem %s2193_s22, 4096  ;;  %p1981_p2 = scmp.lt.s32.totalorder %s2193_s22, %s2193_s22 }
  0x1d   : > { %p1974_p9 = scmp.ne.s32.totalorder %s2193_s22, %s1973_s6  ;;  %p1982_p12 = scmp.lt.s32.totalorder %s1973_s6, %s1973_s6 }
  0x1f   : > { %p1976_p10 = pnand %p1974_p9, %p1962_p13  ;;  %p1983_p0 = por %p1982_p12, %p1981_p2 }
  0x21   : > { %p1977_p1 = pneg %p1976_p10 }
  0x23   : > { %p1984_p6 = pnand %p1983_p0, %p1977_p1 }
  0x25   : > { %1987 = shalt.err (!%p1984_p6)
}
  0x26   : > { %s2120_s7 = smov 256   ;;  %s2121_s8 = smov 16  }
  0x27   : > { %1813 = dma.hbm_to_vmem [thread:$0]  (!%p2200_p11), %s2431_s1, 4096, %s2193_s22, [#allocation6], %s2120_s7, %s2120_s7, %s2121_s8  }
  0x28   : > { %s1988_s21 = scalar_lea.hbm %s2432_s2, 4096 }
  0x29   : > { %p1989_p2 = scmp.ne.s32.totalorder %s2432_s2, %s1988_s21  ;;  %p1995_p10 = scmp.lt.u32.totalorder %s1988_s21, %s2432_s2 }
  0x2b   : > { %p1991_p1 = pnand %p1989_p2, %p1962_p13 }
  0x2d   : > { %p1992_p6 = pneg %p1991_p1 }
  0x2f   : > { %p1997_p3 = pnand %p1995_p10, %p1992_p6 }
  0x31   : > { %2000 = shalt.err (!%p1997_p3)
}
  0x32   : > { %s2001_s22 = scalar_lea.vmem %s2204_s25, 4096  ;;  %p2009_p12 = scmp.lt.s32.totalorder %s2204_s25, %s2204_s25 }
  0x33   : > { %p2002_p5 = scmp.ne.s32.totalorder %s2204_s25, %s2001_s22  ;;  %p2010_p0 = scmp.lt.s32.totalorder %s2001_s22, %s2001_s22 }
  0x35   : > { %p2004_p7 = pnand %p2002_p5, %p1962_p13  ;;  %p2011_p2 = por %p2010_p0, %p2009_p12 }
  0x37   : > { %p2005_p9 = pneg %p2004_p7 }
  0x39   : > { %p2012_p1 = pnand %p2011_p2, %p2005_p9 }
  0x3b   : > { %2015 = shalt.err (!%p2012_p1)
}
  0x3c   : > { %s2122_s29 = smov 64   ;;  %s2123_s30 = smov 4  }
  0x3d   : > { %1816 = dma.hbm_to_vmem [thread:$0]  (!%p2200_p11), %s2432_s2, 4096, %s2204_s25, [#allocation6], %s2122_s29, %s2122_s29, %s2123_s30  }
  0x3e   : > { %s2262_s6 = sadd.s32 1, %s2116_s15   ;;  %s27_s8 = sadd.s32 1, %s2112_s14 }
  0x3f   : > { %s24_s7 = ssub.s32 %s2116_s15, %s2262_s6  ;;  %p34_p6 = scmp.ne.s32.totalorder %s2112_s14, %s2108_s13 }
  0x40   : > { %p25_p13 = scmp.eq.s32.totalorder %s24_s7, 0  ;;  %p35_p10 = scmp.eq.s32.totalorder %s2116_s15, 0 }
  0x41   : > { %p2441_p5 = scmp.eq.s32.totalorder %s2170_s16, 1  ;;  %p1827_p9 = scmp.lt.s32.totalorder %s2116_s15, 2 }
  0x42   : > { %s2271_s9 = scalar_select %p25_p13, %s2112_s14, %s27_s8  }
  0x43   : > { %p36_p3 = por %p35_p10, %p34_p6  ;;  %p2275_p7 = por %p2441_p5, %p34_p6 }
  0x44   : > { %s158_s10 = sand.u32 1, %s2112_s14   ;;  %s1605_s25 = sshll.u32 %s2116_s15, 10 }
  0x45   : > { %s2442_s23 = scalar_select %p2275_p7, 1, 0 }
  0x46   : > { %s1504_s11 = sshll.u32 %s158_s10, 6  ;;  %s2285_s24 = scalar_lea.hbm %s2430_s0, %s1605_s25 }
  0x47   : > { %s162_s26 = scalar_lea.vmem [#allocation2], %s1504_s11  ;;  %p2289_p11 = pnand %p1827_p9, %p36_p3 }
  0x48   : > { %s169_s27 = sshll.u32 %s162_s26, 4  ;;  %s2293_s22 = scalar_lea.sflag [#allocation3], %s158_s10  ;;  %s2287_s27 = int_to_ptr.vmem [resolvable:$true] %s169_s27 }
  0x49   : > { %s2016_s4 = scalar_lea.hbm %s2285_s24, 1024  ;;  %p2018_p0 = pneg %p2289_p11 }
  0x4a   : > { %p2017_p12 = scmp.ne.s32.totalorder %s2285_s24, %s2016_s4  ;;  %s2021_s8 = scalar_lea.hbm %s2430_s0, 2048 }
  0x4b   : > { %p2022_p13 = scmp.lt.u32.totalorder %s2285_s24, %s2430_s0  ;;  %p2023_p6 = scmp.lt.u32.totalorder %s2021_s8, %s2016_s4 }
  0x4c   : > { %p2019_p2 = pnand %p2018_p0, %p2017_p12  ;;  %p2025_p3 = scmp.lt.u32.totalorder %s2016_s4, %s2285_s24 }
  0x4d   : > { %p2024_p10 = por %p2023_p6, %p2022_p13 }
  0x4e   : > { %p2020_p1 = pneg %p2019_p2 }
  0x4f   : > { %p2026_p5 = por %p2025_p3, %p2024_p10 }
  0x51   : > { %p2027_p9 = pnand %p2026_p5, %p2020_p1 }
  0x53   : > { %2030 = shalt.err (!%p2027_p9)
}
  0x54   : > { %s2031_s10 = scalar_lea.vmem %s2287_s27, 1024  ;;  %s2124_s17 = smov [#allocation2]  }
  0x55   : > { %p2032_p12 = scmp.ne.s32.totalorder %s2287_s27, %s2031_s10  ;;  %s2036_s21 = sshll.u32 %s2124_s17, 4  ;;  %s2037_s21 = int_to_ptr.vmem [resolvable:$false] %s2036_s21 }
  0x56   : > { %s2038_s26 = scalar_lea.vmem %s2037_s21, 2048  ;;  %p2039_p4 = scmp.lt.s32.totalorder %s2287_s27, %s2037_s21 }
  0x57   : > { %p2034_p2 = pnand %p2032_p12, %p2018_p0  ;;  %p2040_p13 = scmp.lt.s32.totalorder %s2038_s26, %s2031_s10 }
  0x59   : > { %p2035_p7 = pneg %p2034_p2  ;;  %p2041_p6 = por %p2040_p13, %p2039_p4 }
  0x5b   : > { %p2042_p10 = pnand %p2041_p6, %p2035_p7 }
  0x5d   : > { %2045 = shalt.err (!%p2042_p10)
}
  0x5e   : > { %1820 = dma.hbm_to_vmem [thread:$0]  (!%p2289_p11), %s2285_s24, 1024, %s2287_s27, %s2293_s22, %s2122_s29, %s2122_s29, %s2123_s30  }
  0x5f   : > { %181 = sbr.rel (%p2189_p8) target bundleno = 654 (0x28e), region = 32  ;;  %s2327_s4 = sand.u32 (!%p2189_p8), 1, %s2108_s13  }
  0x60   : > { %s1508_s5 = sshll.u32 (!%p2189_p8), %s2327_s4, 6  ;;  %s184_s7 = scalar_lea.sflag (!%p2189_p8), [#allocation3], %s2327_s4 }
  0x61   : > { %s2333_s28 = scalar_lea.vmem (!%p2189_p8), [#allocation2], %s1508_s5  ;;  %p2444_p4 = scmp.ne.s32.totalorder (!%p2189_p8), %s2437_s18, 0 }
  0x66   : > { %2091 = dma.done.wait (%p2444_p4), %s184_s7, 1024  }
  0x67   : > { %2093 = vsyncadd (%p2444_p4), %s184_s7, 4294966272  ;;  %p2445_p7 = scmp.eq.s32.totalorder %s2170_s16, 0 }
  0x69   : > { %2095 = dma.done.wait (%p2445_p7), [#allocation6], 8192   ;;  %p2446_p8 = pmov %p2445_p7 }
  0x6a   : > { %v2125_v0 = vmov 0   ;;  %v1872_v1 = vld [vmem:[#allocation5 + $0x4] ss:$16 sps:$4 sm:$0xff]   ;;  %v1874_v2 = vld [vmem:[#allocation5 + $0xc] ss:$16 sps:$4 sm:$0xff]   ;;  %s2369_s18 = scalar_lea.vmem [#allocation8], %s1508_s5 }
  0x6b   : > { %2097 = vsyncadd (%p2446_p8), [#allocation6], 4294959104  ;;  %509 = vmatprep.mubr.bf16.mxu0 %v2125_v0  ;;  %622 = vmatprep.mubr.bf16.mxu1 %v2125_v0  ;;  %v1876_v3 = vld [vmem:[#allocation5] ss:$16 sps:$4 sm:$0xff]   ;;  %v1877_v4 = vld [vmem:[#allocation5 + $0x8] ss:$16 sps:$4 sm:$0xff]  }
  0x6c   : > { %477 = vmatprep.subr.bf16.mxu0 %v1872_v1  ;;  %590 = vmatprep.subr.bf16.mxu1 %v1874_v2  ;;  %v1878_v5 = vld [vmem:[#allocation5 + $0x24] ss:$16 sps:$4 sm:$0xff]   ;;  %v1880_v6 = vld [vmem:[#allocation5 + $0x2c] ss:$16 sps:$4 sm:$0xff]   ;;  %v1882_v7 = vld [vmem:[#allocation5 + $0x20] ss:$16 sps:$4 sm:$0xff]  }
  0x6d   : > { %478 = vmatpush1.bf16.msra.mxu0 %v1876_v3  ;;  %591 = vmatpush1.bf16.msra.mxu1 %v1877_v4  ;;  %v1883_v8 = vld [vmem:[#allocation5 + $0x28] ss:$16 sps:$4 sm:$0xff]   ;;  %v1884_v9 = vld [vmem:[#allocation5 + $0x44] ss:$16 sps:$4 sm:$0xff]   ;;  %v1886_v10 = vld [vmem:[#allocation5 + $0x4c] ss:$16 sps:$4 sm:$0xff]  }
  0x6e   : > { %479 = vmatprep.subr.bf16.mxu0 %v1878_v5  ;;  %592 = vmatprep.subr.bf16.mxu1 %v1880_v6  ;;  %v1888_v11 = vld [vmem:[#allocation5 + $0x40] ss:$16 sps:$4 sm:$0xff]   ;;  %v1889_v12 = vld [vmem:[#allocation5 + $0x48] ss:$16 sps:$4 sm:$0xff]   ;;  %v1890_v13 = vld [vmem:[#allocation5 + $0x64] ss:$16 sps:$4 sm:$0xff]  }
  0x6f   : > { %v1892_v14 = vld [vmem:[#allocation5 + $0x6c] ss:$16 sps:$4 sm:$0xff]   ;;  %v1894_v15 = vld [vmem:[#allocation5 + $0x60] ss:$16 sps:$4 sm:$0xff]   ;;  %v1895_v16 = vld [vmem:[#allocation5 + $0x68] ss:$16 sps:$4 sm:$0xff]  }
  0x70   : > { %v1896_v17 = vld [vmem:[#allocation5 + $0x84] ss:$16 sps:$4 sm:$0xff]   ;;  %v1898_v18 = vld [vmem:[#allocation5 + $0x8c] ss:$16 sps:$4 sm:$0xff]   ;;  %v1900_v19 = vld [vmem:[#allocation5 + $0x80] ss:$16 sps:$4 sm:$0xff]  }
  0x71   : > { %480 = vmatpush1.bf16.msra.mxu0 %v1882_v7  ;;  %593 = vmatpush1.bf16.msra.mxu1 %v1883_v8  ;;  %v1901_v20 = vld [vmem:[#allocation5 + $0x88] ss:$16 sps:$4 sm:$0xff]   ;;  %v1902_v21 = vld [vmem:[#allocation5 + $0xa4] ss:$16 sps:$4 sm:$0xff]   ;;  %v1904_v22 = vld [vmem:[#allocation5 + $0xac] ss:$16 sps:$4 sm:$0xff]  }
  0x72   : > { %481 = vmatprep.subr.bf16.mxu0 %v1884_v9  ;;  %594 = vmatprep.subr.bf16.mxu1 %v1886_v10  ;;  %v1906_v23 = vld [vmem:[#allocation5 + $0xa0] ss:$16 sps:$4 sm:$0xff]   ;;  %v1907_v24 = vld [vmem:[#allocation5 + $0xa8] ss:$16 sps:$4 sm:$0xff]   ;;  %v1908_v25 = vld [vmem:[#allocation5 + $0xc4] ss:$16 sps:$4 sm:$0xff]  }
  0x73   : > { %v1910_v26 = vld [vmem:[#allocation5 + $0xcc] ss:$16 sps:$4 sm:$0xff]   ;;  %v1912_v27 = vld [vmem:[#allocation5 + $0xc0] ss:$16 sps:$4 sm:$0xff]   ;;  %v1913_v28 = vld [vmem:[#allocation5 + $0xc8] ss:$16 sps:$4 sm:$0xff]  }
  0x74   : > { %v1914_v29 = vld [vmem:[#allocation5 + $0xe4] ss:$16 sps:$4 sm:$0xff]   ;;  %v1916_v30 = vld [vmem:[#allocation5 + $0xec] ss:$16 sps:$4 sm:$0xff]   ;;  %v1918_v31 = vld [vmem:[#allocation5 + $0xe0] ss:$16 sps:$4 sm:$0xff]  }
  0x75   : > { %482 = vmatpush1.bf16.msra.mxu0 %v1888_v11  ;;  %595 = vmatpush1.bf16.msra.mxu1 %v1889_v12  ;;  %v1919_v32 = vld [vmem:[#allocation5 + $0xe8] ss:$16 sps:$4 sm:$0xff]   ;;  %v1920_v33 = vld [vmem:[%s2333_s28] sm:$0xff]   ;;  %v1936_v43 = vld [vmem:[#allocation7 + $0x50] sm:$0xff]   ;;  %s1622_s20 = sshll.u32 %s2170_s16, 10  ;;  %s1407_s29 = sshll.u32 %s2369_s18, 4  ;;  %s2385_s29 = int_to_ptr.vmem [resolvable:$true] %s1407_s29 }
  0x76   : > { %483 = vmatprep.subr.bf16.mxu0 %v1890_v13  ;;  %596 = vmatprep.subr.bf16.mxu1 %v1892_v14  ;;  %v1928_v34 = vld [vmem:[#allocation7 + $0x40] sm:$0xff]   ;;  %v1932_v38 = vld [vmem:[#allocation7 + $0x48] sm:$0xff]   ;;  %v1937_v44 = vld [vmem:[#allocation7 + $0xd0] sm:$0xff]   ;;  %s2383_s27 = scalar_lea.hbm %s2433_s3, %s1622_s20  ;;  %s1394_s22 = scalar_lea.sflag [#allocation4], %s2327_s4 }
  0x77   : > { %v1929_v35 = vld [vmem:[#allocation7 + $0xc0] sm:$0xff]   ;;  %v1933_v39 = vld [vmem:[#allocation7 + $0xc8] sm:$0xff]   ;;  %v1938_v45 = vld [vmem:[#allocation7 + $0x10] sm:$0xff]   ;;  %s2046_s8 = scalar_lea.vmem %s2385_s29, 1024  ;;  %p2447_p0 = scmp.ne.s32.totalorder %s2442_s23, 0 }
  0x78   : > { %v1930_v36 = vld [vmem:[#allocation7] sm:$0xff]   ;;  %v1934_v40 = vld [vmem:[#allocation7 + $0x8] sm:$0xff]   ;;  %v1939_v46 = vld [vmem:[#allocation7 + $0x90] sm:$0xff]   ;;  %p2047_p11 = scmp.ne.s32.totalorder %s2385_s29, %s2046_s8  ;;  %s2126_s16 = smov [#allocation8]  }
  0x79   : > { %484 = vmatpush1.bf16.msra.mxu0 %v1894_v15  ;;  %597 = vmatpush1.bf16.msra.mxu1 %v1895_v16  ;;  %v1931_v37 = vld [vmem:[#allocation7 + $0x80] sm:$0xff]   ;;  %v1921_v41 = vld [vmem:[%s2333_s28 + $0x8] sm:$0xff]   ;;  %v1940_v47 = vld [vmem:[#allocation7 + $0x58] sm:$0xff]   ;;  %s2050_s11 = sshll.u32 %s2126_s16, 4  ;;  %s2051_s11 = int_to_ptr.vmem [resolvable:$false] %s2050_s11 }
  0x7a   : > { %485 = vmatprep.subr.bf16.mxu0 %v1896_v17  ;;  %598 = vmatprep.subr.bf16.mxu1 %v1898_v18  ;;  %v1935_v42 = vld [vmem:[#allocation7 + $0x88] sm:$0xff]   ;;  %v1941_v48 = vld [vmem:[#allocation7 + $0xd8] sm:$0xff]   ;;  %v1922_v50 = vld [vmem:[%s2333_s28 + $0x10] sm:$0xff]   ;;  %p2048_p1 = pnand %p2047_p11, %p2447_p0  ;;  %s2052_s25 = scalar_lea.vmem %s2051_s11, 2048 }
  0x7b   : > { %v1942_v49 = vld [vmem:[#allocation7 + $0x18] sm:$0xff]   ;;  %v1944_v52 = vld [vmem:[#allocation7 + $0x60] sm:$0xff]   ;;  %v1948_v56 = vld [vmem:[#allocation7 + $0x68] sm:$0xff]   ;;  %p2053_p5 = scmp.lt.s32.totalorder %s2385_s29, %s2051_s11  ;;  %p2054_p9 = scmp.lt.s32.totalorder %s2052_s25, %s2046_s8 }
  0x7c   : > { %v1943_v51 = vld [vmem:[#allocation7 + $0x98] sm:$0xff]   ;;  %v1945_v53 = vld [vmem:[#allocation7 + $0xe0] sm:$0xff]   ;;  %v1949_v57 = vld [vmem:[#allocation7 + $0xe8] sm:$0xff]   ;;  %p2049_p3 = pneg %p2048_p1 }
  0x7d   : > { %486 = vmatpush1.bf16.msra.mxu0 %v1900_v19  ;;  %599 = vmatpush1.bf16.msra.mxu1 %v1901_v20  ;;  %v1946_v54 = vld [vmem:[#allocation7 + $0x20] sm:$0xff]   ;;  %v1950_v58 = vld [vmem:[#allocation7 + $0x28] sm:$0xff]   ;;  %v1923_v59 = vld [vmem:[%s2333_s28 + $0x18] sm:$0xff]   ;;  %p2055_p12 = por %p2054_p9, %p2053_p5 }
  0x7e   : > { %487 = vmatprep.subr.bf16.mxu0 %v1902_v21  ;;  %600 = vmatprep.subr.bf16.mxu1 %v1904_v22  ;;  %v1947_v55 = vld [vmem:[#allocation7 + $0xa0] sm:$0xff]   ;;  %v1951_v60 = vld [vmem:[#allocation7 + $0xa8] sm:$0xff]   ;;  %v1952_v61 = vld [vmem:[#allocation7 + $0x70] sm:$0xff]  }
  0x7f   : > { %v1953_v62 = vld [vmem:[#allocation7 + $0xf0] sm:$0xff]   ;;  %v1924_v2 = vld [vmem:[%s2333_s28 + $0x20] sm:$0xff]   ;;  %v1925_v3 = vld [vmem:[%s2333_s28 + $0x28] sm:$0xff]   ;;  %p2056_p2 = pnand %p2055_p12, %p2049_p3 }
  0x80   : > { %v1954_v63 = vld [vmem:[#allocation7 + $0x30] sm:$0xff]   ;;  %v1927_v5 = vld [vmem:[%s2333_s28 + $0x38] sm:$0xff]  }
  0x81   : > { %488 = vmatpush1.bf16.msra.mxu0 %v1906_v23  ;;  %601 = vmatpush1.bf16.msra.mxu1 %v1907_v24  ;;  %v1955_v1 = vld [vmem:[#allocation7 + $0xb0] sm:$0xff]   ;;  %v1956_v6 = vld [vmem:[#allocation7 + $0x78] sm:$0xff]  }
  0x82   : > { %489 = vmatprep.subr.bf16.mxu0 %v1908_v25  ;;  %602 = vmatprep.subr.bf16.mxu1 %v1910_v26  ;;  %v1926_v4 = vld [vmem:[%s2333_s28 + $0x30] sm:$0xff]   ;;  %v1957_v7 = vld [vmem:[#allocation7 + $0xf8] sm:$0xff]  }
  0x83   : > { %v1958_v8 = vld [vmem:[#allocation7 + $0x38] sm:$0xff]  }
  0x84   : > { %v1959_v9 = vld [vmem:[#allocation7 + $0xb8] sm:$0xff]  }
  0x85   : > { %490 = vmatpush1.bf16.msra.mxu0 %v1912_v27  ;;  %603 = vmatpush1.bf16.msra.mxu1 %v1913_v28 }
  0x86   : > { %491 = vmatprep.subr.bf16.mxu0 %v1914_v29  ;;  %604 = vmatprep.subr.bf16.mxu1 %v1916_v30 }
  0x89   : > { %492 = vmatpush1.bf16.msra.mxu0 %v1918_v31  ;;  %605 = vmatpush1.bf16.msra.mxu1 %v1919_v32 }
  0x8a   : > { %1670 = vmatprep.subr.bf16.mxu0 %v1928_v34  ;;  %1734 = vmatprep.subr.bf16.mxu1 %v1929_v35 }
  0x8c   : > { %510 = vmatmul.mubr.bf16.vlgmr.msra.gmra.mrb[0].mxu0 %v1920_v33  ;;  %623 = vmatmul.mubr.bf16.vlgmr.msra.gmra.mrb[0].mxu1 %v1920_v33 }
  0x8d   : > { %519 = vmatprep.mubr.bf16.mxu0 %v2125_v0  ;;  %632 = vmatprep.mubr.bf16.mxu1 %v2125_v0 }
  0x8e   : > { %1671 = vmatpush3.bf16.msra.mxu0 %v1930_v36  ;;  %1735 = vmatpush3.bf16.msra.mxu1 %v1931_v37 }
  0x8f   : > { %1672 = vmatprep.subr.bf16.mxu0 %v1932_v38  ;;  %1736 = vmatprep.subr.bf16.mxu1 %v1933_v39 }
  0x92   : > { %1673 = vmatpush3.bf16.msra.mxu0 %v1934_v40  ;;  %1737 = vmatpush3.bf16.msra.mxu1 %v1935_v42 }
  0x93   : > { %1674 = vmatprep.subr.bf16.mxu0 %v1936_v43  ;;  %1738 = vmatprep.subr.bf16.mxu1 %v1937_v44 }
  0x94   : > { %520 = vmatmul.mubr.bf16.gmra.mrb[4].mxu0 %v1921_v41  ;;  %633 = vmatmul.mubr.bf16.gmra.mrb[4].mxu1 %v1921_v41 }
  0x95   : > { %529 = vmatprep.mubr.bf16.mxu0 %v2125_v0  ;;  %642 = vmatprep.mubr.bf16.mxu1 %v2125_v0 }
  0x96   : > { %1675 = vmatpush3.bf16.msra.mxu0 %v1938_v45  ;;  %1739 = vmatpush3.bf16.msra.mxu1 %v1939_v46 }
  0x97   : > { %1676 = vmatprep.subr.bf16.mxu0 %v1940_v47  ;;  %1740 = vmatprep.subr.bf16.mxu1 %v1941_v48 }
  0x9a   : > { %1677 = vmatpush3.bf16.msra.mxu0 %v1942_v49  ;;  %1741 = vmatpush3.bf16.msra.mxu1 %v1943_v51 }
  0x9b   : > { %1678 = vmatprep.subr.bf16.mxu0 %v1944_v52  ;;  %1742 = vmatprep.subr.bf16.mxu1 %v1945_v53 }
  0x9c   : > { %530 = vmatmul.mubr.bf16.gmra.mrb[8].mxu0 %v1922_v50  ;;  %643 = vmatmul.mubr.bf16.gmra.mrb[8].mxu1 %v1922_v50 }
  0x9d   : > { %539 = vmatprep.mubr.bf16.mxu0 %v2125_v0  ;;  %652 = vmatprep.mubr.bf16.mxu1 %v2125_v0 }
  0x9e   : > { %1679 = vmatpush3.bf16.msra.mxu0 %v1946_v54  ;;  %1743 = vmatpush3.bf16.msra.mxu1 %v1947_v55 }
  0x9f   : > { %1680 = vmatprep.subr.bf16.mxu0 %v1948_v56  ;;  %1744 = vmatprep.subr.bf16.mxu1 %v1949_v57 }
  0xa2   : > { %1681 = vmatpush3.bf16.msra.mxu0 %v1950_v58  ;;  %1745 = vmatpush3.bf16.msra.mxu1 %v1951_v60 }
  0xa3   : > { %1682 = vmatprep.subr.bf16.mxu0 %v1952_v61  ;;  %1746 = vmatprep.subr.bf16.mxu1 %v1953_v62 }
  0xa4   : > { %540 = vmatmul.mubr.bf16.gmra.mrb[12].mxu0 %v1923_v59  ;;  %653 = vmatmul.mubr.bf16.gmra.mrb[12].mxu1 %v1923_v59 }
  0xa5   : > { %549 = vmatprep.mubr.bf16.mxu0 %v2125_v0  ;;  %662 = vmatprep.mubr.bf16.mxu1 %v2125_v0 }
  0xa6   : > { %1683 = vmatpush3.bf16.msra.mxu0 %v1954_v63  ;;  %1747 = vmatpush3.bf16.msra.mxu1 %v1955_v1 }
  0xa7   : > { %1684 = vmatprep.subr.bf16.mxu0 %v1956_v6  ;;  %1748 = vmatprep.subr.bf16.mxu1 %v1957_v7 }
  0xaa   : > { %1685 = vmatpush3.bf16.msra.mxu0 %v1958_v8  ;;  %1749 = vmatpush3.bf16.msra.mxu1 %v1959_v9 }
  0xac   : > { %550 = vmatmul.mubr.bf16.gmra.mrb[16].mxu0 %v1924_v2  ;;  %663 = vmatmul.mubr.bf16.gmra.mrb[16].mxu1 %v1924_v2 }
  0xad   : > { %559 = vmatprep.mubr.bf16.mxu0 %v2125_v0  ;;  %672 = vmatprep.mubr.bf16.mxu1 %v2125_v0 }
  0xb4   : > { %560 = vmatmul.mubr.bf16.gmra.mrb[20].mxu0 %v1925_v3  ;;  %673 = vmatmul.mubr.bf16.gmra.mrb[20].mxu1 %v1925_v3 }
  0xb5   : > { %569 = vmatprep.mubr.bf16.mxu0 %v2125_v0  ;;  %682 = vmatprep.mubr.bf16.mxu1 %v2125_v0 }
  0xbc   : > { %570 = vmatmul.mubr.bf16.gmra.mrb[24].mxu0 %v1926_v4  ;;  %683 = vmatmul.mubr.bf16.gmra.mrb[24].mxu1 %v1926_v4 }
  0xbd   : > { %579 = vmatprep.mubr.bf16.mxu0 %v2125_v0  ;;  %692 = vmatprep.mubr.bf16.mxu1 %v2125_v0 }
  0xc4   : > { %580 = vmatmul.mubr.bf16.gmra.mrb[28].mxu0 %v1927_v5  ;;  %693 = vmatmul.mubr.bf16.gmra.mrb[28].mxu1 %v1927_v5 }
 0x15f   : > { %v511_v10 = vpop.f32.mrb[0].mxu0  ;;  %v624_v11 = vpop.f32.mrb[0].mxu1 }
 0x160   : > { %v703_v12 = vmax.f32 %v511_v10, 0.0  ;;  %v705_v13 = vmax.f32 %v624_v11, 0.0  ;;  %v513_v14 = vpop.f32.mrb[1].mxu0  ;;  %v626_v15 = vpop.f32.mrb[1].mxu1 }
 0x161   : > { %v704_v16 = vmax.f32 %v513_v14, 0.0  ;;  %v706_v17 = vmax.f32 %v626_v15, 0.0  ;;  %v515_v0 = vpop.f32.mrb[2].mxu0  ;;  %v628_v18 = vpop.f32.mrb[2].mxu1 }
 0x162   : > { %v707_v19 = vmax.f32 %v515_v0, 0.0  ;;  %v709_v20 = vmax.f32 %v628_v18, 0.0  ;;  %v517_v21 = vpop.f32.mrb[3].mxu0  ;;  %v630_v22 = vpop.f32.mrb[3].mxu1  ;;  %v767_v25 = vmul.f32 %v703_v12, %v703_v12  ;;  %v769_v26 = vmul.f32 %v705_v13, %v705_v13 }
 0x163   : > { %v708_v23 = vmax.f32 %v517_v21, 0.0  ;;  %v710_v24 = vmax.f32 %v630_v22, 0.0  ;;  %v768_v29 = vmul.f32 %v704_v16, %v704_v16  ;;  %v770_v30 = vmul.f32 %v706_v17, %v706_v17 }
 0x164   : > { %v771_v27 = vmul.f32 %v707_v19, %v707_v19  ;;  %v773_v28 = vmul.f32 %v709_v20, %v709_v20 }
 0x165   : > { %v772_v31 = vmul.f32 %v708_v23, %v708_v23  ;;  %v774_v32 = vmul.f32 %v710_v24, %v710_v24 }
 0x166   : > { %v831_v33 = vpack.c.bf16 %v771_v27, %v767_v25  ;;  %v833_v34 = vpack.c.bf16 %v773_v28, %v769_v26 }
 0x167   : > { %v832_v35 = vpack.c.bf16 %v772_v31, %v768_v29  ;;  %v834_v36 = vpack.c.bf16 %v774_v32, %v770_v30  ;;  %v521_v37 = vpop.f32.mrb[4].mxu0  ;;  %v634_v38 = vpop.f32.mrb[4].mxu1 }
 0x168   : > { %v711_v39 = vmax.f32 %v521_v37, 0.0  ;;  %v713_v40 = vmax.f32 %v634_v38, 0.0  ;;  %v523_v41 = vpop.f32.mrb[5].mxu0  ;;  %v636_v42 = vpop.f32.mrb[5].mxu1 }
 0x169   : > { %v712_v43 = vmax.f32 %v523_v41, 0.0  ;;  %v714_v44 = vmax.f32 %v636_v42, 0.0  ;;  %v525_v45 = vpop.f32.mrb[6].mxu0  ;;  %v638_v46 = vpop.f32.mrb[6].mxu1  ;;  %1151 = vmatprep.mubr.bf16.mxu0 %v832_v35  ;;  %1248 = vmatprep.mubr.bf16.mxu1 %v834_v36 }
 0x16a   : > { %v715_v47 = vmax.f32 %v525_v45, 0.0  ;;  %v717_v48 = vmax.f32 %v638_v46, 0.0  ;;  %v527_v49 = vpop.f32.mrb[7].mxu0  ;;  %v640_v50 = vpop.f32.mrb[7].mxu1  ;;  %1152 = vmatmul.mubr.bf16.vlgmr.msra.gmra.mrb[32].mxu0 %v831_v33  ;;  %1249 = vmatmul.mubr.bf16.vlgmr.msra.gmra.mrb[32].mxu1 %v833_v34  ;;  %v775_v53 = vmul.f32 %v711_v39, %v711_v39  ;;  %v777_v54 = vmul.f32 %v713_v40, %v713_v40 }
 0x16b   : > { %v716_v51 = vmax.f32 %v527_v49, 0.0  ;;  %v718_v52 = vmax.f32 %v640_v50, 0.0  ;;  %v776_v57 = vmul.f32 %v712_v43, %v712_v43  ;;  %v778_v58 = vmul.f32 %v714_v44, %v714_v44 }
 0x16c   : > { %v779_v55 = vmul.f32 %v715_v47, %v715_v47  ;;  %v781_v56 = vmul.f32 %v717_v48, %v717_v48 }
 0x16d   : > { %v780_v59 = vmul.f32 %v716_v51, %v716_v51  ;;  %v782_v60 = vmul.f32 %v718_v52, %v718_v52 }
 0x16e   : > { %v835_v61 = vpack.c.bf16 %v779_v55, %v775_v53  ;;  %v837_v62 = vpack.c.bf16 %v781_v56, %v777_v54 }
 0x16f   : > { %v836_v63 = vpack.c.bf16 %v780_v59, %v776_v57  ;;  %v838_v1 = vpack.c.bf16 %v782_v60, %v778_v58  ;;  %v531_v2 = vpop.f32.mrb[8].mxu0  ;;  %v644_v3 = vpop.f32.mrb[8].mxu1 }
 0x170   : > { %v719_v4 = vmax.f32 %v531_v2, 0.0  ;;  %v721_v5 = vmax.f32 %v644_v3, 0.0  ;;  %v533_v6 = vpop.f32.mrb[9].mxu0  ;;  %v646_v7 = vpop.f32.mrb[9].mxu1 }
 0x171   : > { %v720_v8 = vmax.f32 %v533_v6, 0.0  ;;  %v722_v9 = vmax.f32 %v646_v7, 0.0  ;;  %v535_v10 = vpop.f32.mrb[10].mxu0  ;;  %v648_v11 = vpop.f32.mrb[10].mxu1  ;;  %1159 = vmatprep.mubr.bf16.mxu0 %v836_v63  ;;  %1256 = vmatprep.mubr.bf16.mxu1 %v838_v1 }
 0x172   : > { %v723_v12 = vmax.f32 %v535_v10, 0.0  ;;  %v725_v13 = vmax.f32 %v648_v11, 0.0  ;;  %v537_v14 = vpop.f32.mrb[11].mxu0  ;;  %v650_v15 = vpop.f32.mrb[11].mxu1  ;;  %1160 = vmatmul.mubr.bf16.gmra.mrb[36].mxu0 %v835_v61  ;;  %1257 = vmatmul.mubr.bf16.gmra.mrb[36].mxu1 %v837_v62  ;;  %v783_v0 = vmul.f32 %v719_v4, %v719_v4  ;;  %v785_v18 = vmul.f32 %v721_v5, %v721_v5 }
 0x173   : > { %v724_v16 = vmax.f32 %v537_v14, 0.0  ;;  %v726_v17 = vmax.f32 %v650_v15, 0.0  ;;  %v784_v21 = vmul.f32 %v720_v8, %v720_v8  ;;  %v786_v22 = vmul.f32 %v722_v9, %v722_v9 }
 0x174   : > { %v787_v19 = vmul.f32 %v723_v12, %v723_v12  ;;  %v789_v20 = vmul.f32 %v725_v13, %v725_v13 }
 0x175   : > { %v788_v23 = vmul.f32 %v724_v16, %v724_v16  ;;  %v790_v24 = vmul.f32 %v726_v17, %v726_v17 }
 0x176   : > { %v839_v25 = vpack.c.bf16 %v787_v19, %v783_v0  ;;  %v841_v26 = vpack.c.bf16 %v789_v20, %v785_v18 }
 0x177   : > { %v840_v27 = vpack.c.bf16 %v788_v23, %v784_v21  ;;  %v842_v28 = vpack.c.bf16 %v790_v24, %v786_v22  ;;  %v541_v29 = vpop.f32.mrb[12].mxu0  ;;  %v654_v30 = vpop.f32.mrb[12].mxu1 }
 0x178   : > { %v727_v31 = vmax.f32 %v541_v29, 0.0  ;;  %v729_v32 = vmax.f32 %v654_v30, 0.0  ;;  %v543_v33 = vpop.f32.mrb[13].mxu0  ;;  %v656_v34 = vpop.f32.mrb[13].mxu1 }
 0x179   : > { %v728_v35 = vmax.f32 %v543_v33, 0.0  ;;  %v730_v36 = vmax.f32 %v656_v34, 0.0  ;;  %v545_v37 = vpop.f32.mrb[14].mxu0  ;;  %v658_v38 = vpop.f32.mrb[14].mxu1  ;;  %1167 = vmatprep.mubr.bf16.mxu0 %v840_v27  ;;  %1264 = vmatprep.mubr.bf16.mxu1 %v842_v28 }
 0x17a   : > { %v731_v39 = vmax.f32 %v545_v37, 0.0  ;;  %v733_v40 = vmax.f32 %v658_v38, 0.0  ;;  %v547_v41 = vpop.f32.mrb[15].mxu0  ;;  %v660_v42 = vpop.f32.mrb[15].mxu1  ;;  %1168 = vmatmul.mubr.bf16.gmra.mrb[40].mxu0 %v839_v25  ;;  %1265 = vmatmul.mubr.bf16.gmra.mrb[40].mxu1 %v841_v26  ;;  %v791_v45 = vmul.f32 %v727_v31, %v727_v31  ;;  %v793_v46 = vmul.f32 %v729_v32, %v729_v32 }
 0x17b   : > { %v732_v43 = vmax.f32 %v547_v41, 0.0  ;;  %v734_v44 = vmax.f32 %v660_v42, 0.0  ;;  %v792_v49 = vmul.f32 %v728_v35, %v728_v35  ;;  %v794_v50 = vmul.f32 %v730_v36, %v730_v36 }
 0x17c   : > { %v795_v47 = vmul.f32 %v731_v39, %v731_v39  ;;  %v797_v48 = vmul.f32 %v733_v40, %v733_v40 }
 0x17d   : > { %v796_v51 = vmul.f32 %v732_v43, %v732_v43  ;;  %v798_v52 = vmul.f32 %v734_v44, %v734_v44 }
 0x17e   : > { %v843_v53 = vpack.c.bf16 %v795_v47, %v791_v45  ;;  %v845_v54 = vpack.c.bf16 %v797_v48, %v793_v46 }
 0x17f   : > { %v844_v55 = vpack.c.bf16 %v796_v51, %v792_v49  ;;  %v846_v56 = vpack.c.bf16 %v798_v52, %v794_v50  ;;  %v551_v57 = vpop.f32.mrb[16].mxu0  ;;  %v664_v58 = vpop.f32.mrb[16].mxu1 }
 0x180   : > { %v735_v59 = vmax.f32 %v551_v57, 0.0  ;;  %v737_v60 = vmax.f32 %v664_v58, 0.0  ;;  %v553_v61 = vpop.f32.mrb[17].mxu0  ;;  %v666_v62 = vpop.f32.mrb[17].mxu1 }
 0x181   : > { %v736_v63 = vmax.f32 %v553_v61, 0.0  ;;  %v738_v1 = vmax.f32 %v666_v62, 0.0  ;;  %v555_v2 = vpop.f32.mrb[18].mxu0  ;;  %v668_v3 = vpop.f32.mrb[18].mxu1  ;;  %1175 = vmatprep.mubr.bf16.mxu0 %v844_v55  ;;  %1272 = vmatprep.mubr.bf16.mxu1 %v846_v56 }
 0x182   : > { %v739_v4 = vmax.f32 %v555_v2, 0.0  ;;  %v741_v5 = vmax.f32 %v668_v3, 0.0  ;;  %v557_v6 = vpop.f32.mrb[19].mxu0  ;;  %v670_v7 = vpop.f32.mrb[19].mxu1  ;;  %1176 = vmatmul.mubr.bf16.gmra.mrb[44].mxu0 %v843_v53  ;;  %1273 = vmatmul.mubr.bf16.gmra.mrb[44].mxu1 %v845_v54  ;;  %v799_v10 = vmul.f32 %v735_v59, %v735_v59  ;;  %v801_v11 = vmul.f32 %v737_v60, %v737_v60 }
 0x183   : > { %v740_v8 = vmax.f32 %v557_v6, 0.0  ;;  %v742_v9 = vmax.f32 %v670_v7, 0.0  ;;  %v800_v14 = vmul.f32 %v736_v63, %v736_v63  ;;  %v802_v15 = vmul.f32 %v738_v1, %v738_v1 }
 0x184   : > { %v803_v12 = vmul.f32 %v739_v4, %v739_v4  ;;  %v805_v13 = vmul.f32 %v741_v5, %v741_v5 }
 0x185   : > { %v804_v16 = vmul.f32 %v740_v8, %v740_v8  ;;  %v806_v17 = vmul.f32 %v742_v9, %v742_v9 }
 0x186   : > { %v847_v0 = vpack.c.bf16 %v803_v12, %v799_v10  ;;  %v849_v18 = vpack.c.bf16 %v805_v13, %v801_v11 }
 0x187   : > { %v848_v19 = vpack.c.bf16 %v804_v16, %v800_v14  ;;  %v850_v20 = vpack.c.bf16 %v806_v17, %v802_v15  ;;  %v561_v21 = vpop.f32.mrb[20].mxu0  ;;  %v674_v22 = vpop.f32.mrb[20].mxu1 }
 0x188   : > { %v743_v23 = vmax.f32 %v561_v21, 0.0  ;;  %v745_v24 = vmax.f32 %v674_v22, 0.0  ;;  %v563_v25 = vpop.f32.mrb[21].mxu0  ;;  %v676_v26 = vpop.f32.mrb[21].mxu1 }
 0x189   : > { %v744_v27 = vmax.f32 %v563_v25, 0.0  ;;  %v746_v28 = vmax.f32 %v676_v26, 0.0  ;;  %v565_v29 = vpop.f32.mrb[22].mxu0  ;;  %v678_v30 = vpop.f32.mrb[22].mxu1  ;;  %1183 = vmatprep.mubr.bf16.mxu0 %v848_v19  ;;  %1280 = vmatprep.mubr.bf16.mxu1 %v850_v20 }
 0x18a   : > { %v747_v31 = vmax.f32 %v565_v29, 0.0  ;;  %v749_v32 = vmax.f32 %v678_v30, 0.0  ;;  %v567_v33 = vpop.f32.mrb[23].mxu0  ;;  %v680_v34 = vpop.f32.mrb[23].mxu1  ;;  %1184 = vmatmul.mubr.bf16.gmra.mrb[48].mxu0 %v847_v0  ;;  %1281 = vmatmul.mubr.bf16.gmra.mrb[48].mxu1 %v849_v18  ;;  %v807_v37 = vmul.f32 %v743_v23, %v743_v23  ;;  %v809_v38 = vmul.f32 %v745_v24, %v745_v24 }
 0x18b   : > { %v748_v35 = vmax.f32 %v567_v33, 0.0  ;;  %v750_v36 = vmax.f32 %v680_v34, 0.0  ;;  %v808_v41 = vmul.f32 %v744_v27, %v744_v27  ;;  %v810_v42 = vmul.f32 %v746_v28, %v746_v28 }
 0x18c   : > { %v811_v39 = vmul.f32 %v747_v31, %v747_v31  ;;  %v813_v40 = vmul.f32 %v749_v32, %v749_v32 }
 0x18d   : > { %v812_v43 = vmul.f32 %v748_v35, %v748_v35  ;;  %v814_v44 = vmul.f32 %v750_v36, %v750_v36 }
 0x18e   : > { %v851_v45 = vpack.c.bf16 %v811_v39, %v807_v37  ;;  %v853_v46 = vpack.c.bf16 %v813_v40, %v809_v38 }
 0x18f   : > { %v852_v47 = vpack.c.bf16 %v812_v43, %v808_v41  ;;  %v854_v48 = vpack.c.bf16 %v814_v44, %v810_v42  ;;  %v571_v49 = vpop.f32.mrb[24].mxu0  ;;  %v684_v50 = vpop.f32.mrb[24].mxu1 }
 0x190   : > { %v751_v51 = vmax.f32 %v571_v49, 0.0  ;;  %v753_v52 = vmax.f32 %v684_v50, 0.0  ;;  %v573_v53 = vpop.f32.mrb[25].mxu0  ;;  %v686_v54 = vpop.f32.mrb[25].mxu1 }
 0x191   : > { %v752_v55 = vmax.f32 %v573_v53, 0.0  ;;  %v754_v56 = vmax.f32 %v686_v54, 0.0  ;;  %v575_v57 = vpop.f32.mrb[26].mxu0  ;;  %v688_v58 = vpop.f32.mrb[26].mxu1  ;;  %1191 = vmatprep.mubr.bf16.mxu0 %v852_v47  ;;  %1288 = vmatprep.mubr.bf16.mxu1 %v854_v48 }
 0x192   : > { %v755_v59 = vmax.f32 %v575_v57, 0.0  ;;  %v757_v60 = vmax.f32 %v688_v58, 0.0  ;;  %v577_v61 = vpop.f32.mrb[27].mxu0  ;;  %v690_v62 = vpop.f32.mrb[27].mxu1  ;;  %1192 = vmatmul.mubr.bf16.gmra.mrb[52].mxu0 %v851_v45  ;;  %1289 = vmatmul.mubr.bf16.gmra.mrb[52].mxu1 %v853_v46  ;;  %v815_v2 = vmul.f32 %v751_v51, %v751_v51  ;;  %v817_v3 = vmul.f32 %v753_v52, %v753_v52 }
 0x193   : > { %v756_v63 = vmax.f32 %v577_v61, 0.0  ;;  %v758_v1 = vmax.f32 %v690_v62, 0.0  ;;  %v816_v6 = vmul.f32 %v752_v55, %v752_v55  ;;  %v818_v7 = vmul.f32 %v754_v56, %v754_v56 }
 0x194   : > { %v819_v4 = vmul.f32 %v755_v59, %v755_v59  ;;  %v821_v5 = vmul.f32 %v757_v60, %v757_v60 }
 0x195   : > { %v820_v8 = vmul.f32 %v756_v63, %v756_v63  ;;  %v822_v9 = vmul.f32 %v758_v1, %v758_v1 }
 0x196   : > { %v855_v10 = vpack.c.bf16 %v819_v4, %v815_v2  ;;  %v857_v11 = vpack.c.bf16 %v821_v5, %v817_v3 }
 0x197   : > { %v856_v12 = vpack.c.bf16 %v820_v8, %v816_v6  ;;  %v858_v13 = vpack.c.bf16 %v822_v9, %v818_v7  ;;  %v581_v14 = vpop.f32.mrb[28].mxu0  ;;  %v694_v15 = vpop.f32.mrb[28].mxu1 }
 0x198   : > { %v759_v16 = vmax.f32 %v581_v14, 0.0  ;;  %v761_v17 = vmax.f32 %v694_v15, 0.0  ;;  %v583_v0 = vpop.f32.mrb[29].mxu0  ;;  %v696_v18 = vpop.f32.mrb[29].mxu1 }
 0x199   : > { %v760_v19 = vmax.f32 %v583_v0, 0.0  ;;  %v762_v20 = vmax.f32 %v696_v18, 0.0  ;;  %v585_v21 = vpop.f32.mrb[30].mxu0  ;;  %v698_v22 = vpop.f32.mrb[30].mxu1  ;;  %1199 = vmatprep.mubr.bf16.mxu0 %v856_v12  ;;  %1296 = vmatprep.mubr.bf16.mxu1 %v858_v13 }
 0x19a   : > { %v763_v23 = vmax.f32 %v585_v21, 0.0  ;;  %v765_v24 = vmax.f32 %v698_v22, 0.0  ;;  %v587_v25 = vpop.f32.mrb[31].mxu0  ;;  %v700_v26 = vpop.f32.mrb[31].mxu1  ;;  %1200 = vmatmul.mubr.bf16.gmra.mrb[56].mxu0 %v855_v10  ;;  %1297 = vmatmul.mubr.bf16.gmra.mrb[56].mxu1 %v857_v11  ;;  %v823_v29 = vmul.f32 %v759_v16, %v759_v16  ;;  %v825_v30 = vmul.f32 %v761_v17, %v761_v17 }
 0x19b   : > { %v764_v27 = vmax.f32 %v587_v25, 0.0  ;;  %v766_v28 = vmax.f32 %v700_v26, 0.0  ;;  %v824_v33 = vmul.f32 %v760_v19, %v760_v19  ;;  %v826_v34 = vmul.f32 %v762_v20, %v762_v20 }
 0x19c   : > { %v827_v31 = vmul.f32 %v763_v23, %v763_v23  ;;  %v829_v32 = vmul.f32 %v765_v24, %v765_v24 }
 0x19d   : > { %v828_v35 = vmul.f32 %v764_v27, %v764_v27  ;;  %v830_v36 = vmul.f32 %v766_v28, %v766_v28 }
 0x19e   : > { %v859_v37 = vpack.c.bf16 %v827_v31, %v823_v29  ;;  %v861_v38 = vpack.c.bf16 %v829_v32, %v825_v30 }
 0x19f   : > { %v860_v39 = vpack.c.bf16 %v828_v35, %v824_v33  ;;  %v862_v40 = vpack.c.bf16 %v830_v36, %v826_v34 }
 0x1a1   : > { %1207 = vmatprep.mubr.bf16.mxu0 %v860_v39  ;;  %1304 = vmatprep.mubr.bf16.mxu1 %v862_v40 }
 0x1a2   : > { %1208 = vmatmul.mubr.bf16.gmra.mrb[60].mxu0 %v859_v37  ;;  %1305 = vmatmul.mubr.bf16.gmra.mrb[60].mxu1 %v861_v38 }
 0x23d   : > { %v1686_v41 = vpop.f32.mrb[32].mxu0  ;;  %v1750_v42 = vpop.f32.mrb[32].mxu1 }
 0x23e   : > { %v1687_v43 = vpop.f32.mrb[33].mxu0  ;;  %v1751_v44 = vpop.f32.mrb[33].mxu1 }
 0x23f   : > { %v1688_v45 = vadd.f32 %v1687_v43, %v1686_v41  ;;  %v1752_v46 = vadd.f32 %v1751_v44, %v1750_v42  ;;  %v1689_v47 = vpop.f32.mrb[34].mxu0  ;;  %v1753_v48 = vpop.f32.mrb[34].mxu1 }
 0x240   : > { %v1690_v49 = vpop.f32.mrb[35].mxu0  ;;  %v1754_v50 = vpop.f32.mrb[35].mxu1 }
 0x241   : > { %v1251_v51 = vadd.f32 %v1752_v46, %v1688_v45  ;;  %v1691_v52 = vadd.f32 %v1690_v49, %v1689_v47  ;;  %v1755_v53 = vadd.f32 %v1754_v50, %v1753_v48 }
 0x243   : > { %v1254_v54 = vadd.f32 %v1755_v53, %v1691_v52 }
 0x245   : > { %v1626_v55 = vpack.c.bf16 %v1254_v54, %v1251_v51  ;;  %v1692_v56 = vpop.f32.mrb[36].mxu0  ;;  %v1756_v57 = vpop.f32.mrb[36].mxu1 }
 0x246   : > { %v1693_v58 = vpop.f32.mrb[37].mxu0  ;;  %v1757_v59 = vpop.f32.mrb[37].mxu1 }
 0x247   : > { %1627 = vst [vmem:[%s2369_s18] sm:$0xff] %v1626_v55   ;;  %v1694_v60 = vadd.f32 %v1693_v58, %v1692_v56  ;;  %v1758_v61 = vadd.f32 %v1757_v59, %v1756_v57  ;;  %v1695_v62 = vpop.f32.mrb[38].mxu0  ;;  %v1759_v63 = vpop.f32.mrb[38].mxu1 }
 0x248   : > { %v1696_v1 = vpop.f32.mrb[39].mxu0  ;;  %v1760_v2 = vpop.f32.mrb[39].mxu1 }
 0x249   : > { %v1259_v3 = vadd.f32 %v1758_v61, %v1694_v60  ;;  %v1697_v4 = vadd.f32 %v1696_v1, %v1695_v62  ;;  %v1761_v5 = vadd.f32 %v1760_v2, %v1759_v63 }
 0x24b   : > { %v1262_v6 = vadd.f32 %v1761_v5, %v1697_v4 }
 0x24d   : > { %v1631_v7 = vpack.c.bf16 %v1262_v6, %v1259_v3  ;;  %v1698_v8 = vpop.f32.mrb[40].mxu0  ;;  %v1762_v9 = vpop.f32.mrb[40].mxu1 }
 0x24e   : > { %v1699_v10 = vpop.f32.mrb[41].mxu0  ;;  %v1763_v11 = vpop.f32.mrb[41].mxu1 }
 0x24f   : > { %1663 = vst [vmem:[%s2369_s18 + $0x8] sm:$0xff] %v1631_v7   ;;  %v1700_v12 = vadd.f32 %v1699_v10, %v1698_v8  ;;  %v1764_v13 = vadd.f32 %v1763_v11, %v1762_v9  ;;  %v1701_v14 = vpop.f32.mrb[42].mxu0  ;;  %v1765_v15 = vpop.f32.mrb[42].mxu1 }
 0x250   : > { %v1702_v16 = vpop.f32.mrb[43].mxu0  ;;  %v1766_v17 = vpop.f32.mrb[43].mxu1 }
 0x251   : > { %v1267_v0 = vadd.f32 %v1764_v13, %v1700_v12  ;;  %v1703_v18 = vadd.f32 %v1702_v16, %v1701_v14  ;;  %v1767_v19 = vadd.f32 %v1766_v17, %v1765_v15 }
 0x253   : > { %v1270_v20 = vadd.f32 %v1767_v19, %v1703_v18 }
 0x255   : > { %v1636_v21 = vpack.c.bf16 %v1270_v20, %v1267_v0  ;;  %v1704_v22 = vpop.f32.mrb[44].mxu0  ;;  %v1768_v23 = vpop.f32.mrb[44].mxu1 }
 0x256   : > { %v1705_v24 = vpop.f32.mrb[45].mxu0  ;;  %v1769_v25 = vpop.f32.mrb[45].mxu1 }
 0x257   : > { %1664 = vst [vmem:[%s2369_s18 + $0x10] sm:$0xff] %v1636_v21   ;;  %v1706_v26 = vadd.f32 %v1705_v24, %v1704_v22  ;;  %v1770_v27 = vadd.f32 %v1769_v25, %v1768_v23  ;;  %v1707_v28 = vpop.f32.mrb[46].mxu0  ;;  %v1771_v29 = vpop.f32.mrb[46].mxu1 }
 0x258   : > { %v1708_v30 = vpop.f32.mrb[47].mxu0  ;;  %v1772_v31 = vpop.f32.mrb[47].mxu1 }
 0x259   : > { %v1275_v32 = vadd.f32 %v1770_v27, %v1706_v26  ;;  %v1709_v33 = vadd.f32 %v1708_v30, %v1707_v28  ;;  %v1773_v34 = vadd.f32 %v1772_v31, %v1771_v29 }
 0x25b   : > { %v1278_v35 = vadd.f32 %v1773_v34, %v1709_v33 }
 0x25d   : > { %v1641_v36 = vpack.c.bf16 %v1278_v35, %v1275_v32  ;;  %v1710_v37 = vpop.f32.mrb[48].mxu0  ;;  %v1774_v38 = vpop.f32.mrb[48].mxu1 }
 0x25e   : > { %v1711_v39 = vpop.f32.mrb[49].mxu0  ;;  %v1775_v40 = vpop.f32.mrb[49].mxu1 }
 0x25f   : > { %1665 = vst [vmem:[%s2369_s18 + $0x18] sm:$0xff] %v1641_v36   ;;  %v1712_v41 = vadd.f32 %v1711_v39, %v1710_v37  ;;  %v1776_v42 = vadd.f32 %v1775_v40, %v1774_v38  ;;  %v1713_v43 = vpop.f32.mrb[50].mxu0  ;;  %v1777_v44 = vpop.f32.mrb[50].mxu1 }
 0x260   : > { %v1714_v45 = vpop.f32.mrb[51].mxu0  ;;  %v1778_v46 = vpop.f32.mrb[51].mxu1 }
 0x261   : > { %v1283_v47 = vadd.f32 %v1776_v42, %v1712_v41  ;;  %v1715_v48 = vadd.f32 %v1714_v45, %v1713_v43  ;;  %v1779_v49 = vadd.f32 %v1778_v46, %v1777_v44 }
 0x263   : > { %v1286_v50 = vadd.f32 %v1779_v49, %v1715_v48 }
 0x265   : > { %v1646_v51 = vpack.c.bf16 %v1286_v50, %v1283_v47  ;;  %v1716_v52 = vpop.f32.mrb[52].mxu0  ;;  %v1780_v53 = vpop.f32.mrb[52].mxu1 }
 0x266   : > { %v1717_v54 = vpop.f32.mrb[53].mxu0  ;;  %v1781_v55 = vpop.f32.mrb[53].mxu1 }
 0x267   : > { %1666 = vst [vmem:[%s2369_s18 + $0x20] sm:$0xff] %v1646_v51   ;;  %v1718_v56 = vadd.f32 %v1717_v54, %v1716_v52  ;;  %v1782_v57 = vadd.f32 %v1781_v55, %v1780_v53  ;;  %v1719_v58 = vpop.f32.mrb[54].mxu0  ;;  %v1783_v59 = vpop.f32.mrb[54].mxu1 }
 0x268   : > { %v1720_v60 = vpop.f32.mrb[55].mxu0  ;;  %v1784_v61 = vpop.f32.mrb[55].mxu1 }
 0x269   : > { %v1291_v62 = vadd.f32 %v1782_v57, %v1718_v56  ;;  %v1721_v63 = vadd.f32 %v1720_v60, %v1719_v58  ;;  %v1785_v1 = vadd.f32 %v1784_v61, %v1783_v59 }
 0x26b   : > { %v1294_v2 = vadd.f32 %v1785_v1, %v1721_v63 }
 0x26d   : > { %v1651_v3 = vpack.c.bf16 %v1294_v2, %v1291_v62  ;;  %v1722_v4 = vpop.f32.mrb[56].mxu0  ;;  %v1786_v5 = vpop.f32.mrb[56].mxu1 }
 0x26e   : > { %v1723_v6 = vpop.f32.mrb[57].mxu0  ;;  %v1787_v7 = vpop.f32.mrb[57].mxu1 }
 0x26f   : > { %1667 = vst [vmem:[%s2369_s18 + $0x28] sm:$0xff] %v1651_v3   ;;  %v1724_v8 = vadd.f32 %v1723_v6, %v1722_v4  ;;  %v1788_v9 = vadd.f32 %v1787_v7, %v1786_v5  ;;  %v1725_v10 = vpop.f32.mrb[58].mxu0  ;;  %v1789_v11 = vpop.f32.mrb[58].mxu1 }
 0x270   : > { %v1726_v12 = vpop.f32.mrb[59].mxu0  ;;  %v1790_v13 = vpop.f32.mrb[59].mxu1 }
 0x271   : > { %v1299_v14 = vadd.f32 %v1788_v9, %v1724_v8  ;;  %v1727_v15 = vadd.f32 %v1726_v12, %v1725_v10  ;;  %v1791_v16 = vadd.f32 %v1790_v13, %v1789_v11 }
 0x273   : > { %v1302_v17 = vadd.f32 %v1791_v16, %v1727_v15 }
 0x275   : > { %v1656_v0 = vpack.c.bf16 %v1302_v17, %v1299_v14  ;;  %v1728_v18 = vpop.f32.mrb[60].mxu0  ;;  %v1792_v19 = vpop.f32.mrb[60].mxu1 }
 0x276   : > { %v1729_v20 = vpop.f32.mrb[61].mxu0  ;;  %v1793_v21 = vpop.f32.mrb[61].mxu1 }
 0x277   : > { %1668 = vst [vmem:[%s2369_s18 + $0x30] sm:$0xff] %v1656_v0   ;;  %v1730_v22 = vadd.f32 %v1729_v20, %v1728_v18  ;;  %v1794_v23 = vadd.f32 %v1793_v21, %v1792_v19  ;;  %v1731_v24 = vpop.f32.mrb[62].mxu0  ;;  %v1795_v25 = vpop.f32.mrb[62].mxu1 }
 0x278   : > { %v1732_v26 = vpop.f32.mrb[63].mxu0  ;;  %v1796_v27 = vpop.f32.mrb[63].mxu1 }
 0x279   : > { %v1307_v28 = vadd.f32 %v1794_v23, %v1730_v22  ;;  %v1733_v29 = vadd.f32 %v1732_v26, %v1731_v24  ;;  %v1797_v30 = vadd.f32 %v1796_v27, %v1795_v25 }
 0x27b   : > { %v1310_v31 = vadd.f32 %v1797_v30, %v1733_v29 }
 0x27d   : > { %v1661_v32 = vpack.c.bf16 %v1310_v31, %v1307_v28 }
 0x27f   : > { %1669 = vst [vmem:[%s2369_s18 + $0x38] sm:$0xff] %v1661_v32  }
 0x280   : > { %2059 = shalt.err (!%p2056_p2)
}
 0x281   : > { %s2060_s10 = scalar_lea.hbm %s2383_s27, 1024  ;;  %s2064_s26 = scalar_lea.hbm %s2433_s3, 2048 }
 0x282   : > { %p2061_p13 = scmp.ne.s32.totalorder %s2383_s27, %s2060_s10  ;;  %p2065_p4 = scmp.lt.u32.totalorder %s2383_s27, %s2433_s3 }
 0x283   : > { %p2066_p7 = scmp.lt.u32.totalorder %s2064_s26, %s2060_s10  ;;  %p2068_p11 = scmp.lt.u32.totalorder %s2060_s10, %s2383_s27 }
 0x284   : > { %p2062_p6 = pnand %p2061_p13, %p2447_p0 }
 0x285   : > { %p2067_p8 = por %p2066_p7, %p2065_p4 }
 0x286   : > { %p2063_p10 = pneg %p2062_p6 }
 0x287   : > { %p2069_p1 = por %p2068_p11, %p2067_p8 }
 0x289   : > { %p2070_p3 = pnand %p2069_p1, %p2063_p10 }
 0x28b   : > { %2073 = shalt.err (!%p2070_p3)
}
 0x28c   : > { %s2127_s28 = smov 64   ;;  %s2128_s18 = smov 4  }
 0x28d   : > { %1808 = dma.vmem_to_hbm [thread:$0]  (%p2447_p0), %s2385_s29, 1024, %s2383_s27, %s1394_s22, %s2127_s28, %s2127_s28, %s2128_s18  }
 0x28e PF: > { %s1422_s20 = sand.u32 1, %s2104_s12   ;;  %p2448_p5 = scmp.ne.s32.totalorder %s2438_s19, 0 }
 0x28f   : > { %p2449_p9 = scmp.ge.s32.totalorder %s2116_s15, 2  ;;  %s1423_s30 = scalar_lea.sflag [#allocation4], %s1422_s20 }
 0x291   : > { %p1822_p12 = pnand %p2449_p9, %p2448_p5 }
 0x293   : > { %2099 = dma.done.wait (!%p1822_p12), %s1423_s30, 1024  }
 0x294   : > { %2101 = vsyncadd (!%p1822_p12), %s1423_s30, 4294966272  ;;  %p17_p2 = scmp.ge.s32.totalorder %s2262_s6, 4   ;;  %s2450_s12 = smov %s2108_s13 }
 0x295   : > { %s2451_s13 = smov %s2112_s14  ;;  %s2452_s14 = smov %s2271_s9 }
 0x296   : > { %s2453_s15 = smov %s2262_s6  ;;  %19 = sbr.rel (!%p17_p2) target bundleno = 6 (0x6), region = 85 }
 0x29d   :  { %1428 = vsyncpa [#allocation3], 1 }
 0x29e   :  { %1430 = vsyncpa [#allocation3 + $0x1], 1 }
 0x29f   :  { %1431 = vsyncpa [#allocation6], 1 }
 0x2a0   :  { %1432 = vsyncpa [#allocation4], 1 }
 0x2a1   :  { %1434 = vsyncpa [#allocation4 + $0x1], 1 }

</bundles_post_ra>
